<compile_context>
chip_gen: v6e
topology: v6e:2x2x1
jax: 0.10.0
libtpu: 0.0.40
codegen_flags: <defaults>
</compile_context>

<pallas_src>
import jax
import jax.numpy as jnp
from jax.experimental import pallas as pl
from jax.experimental.pallas import tpu as pltpu

_LANE = 128
_NEG = -1e30     # "minus infinity" bias for padded class lanes (finite -> no NaNs)
_MIB = 1 << 20


def _round_up(n, m):
    return ((n + m - 1) // m) * m


# ----------------------------------------------------------------------------
# Kernel: whole 6-layer MLP + log_softmax on one (TM, in_pad) row tile.
# Weights/biases are full, VMEM-resident blocks (constant index_map).
# ----------------------------------------------------------------------------
def _ann_kernel(x_ref,
                w1, b1, w2, b2, w3, b3, w4, b4, w5, b5, w6, b6,
                out_ref):
    h = x_ref[...]                                           # bf16 (TM, in_pad)

    def layer(h_bf16, w_ref, b_ref, relu=True):
        # bf16 x bf16 MXU matmul, f32 accumulation; bias/ReLU in f32;
        # hidden activations carried in bf16.
        z = jnp.dot(h_bf16, w_ref[...],
                    preferred_element_type=jnp.float32) + b_ref[...]
        if relu:
            return jnp.maximum(z, 0.0).astype(jnp.bfloat16)
        return z                                             # logits stay f32

    h = layer(h, w1, b1)                                     # (TM, 512)
    h = layer(h, w2, b2)                                     # (TM, 256)
    h = layer(h, w3, b3)                                     # (TM, 128)
    h = layer(h, w4, b4)                                     # (TM, 128)  (64 real)
    h = layer(h, w5, b5)                                     # (TM, 128)  (32 real)
    logits = layer(h, w6, b6, relu=False)                    # (TM, out_pad) f32

    # Stable log_softmax; padded lanes carry a -1e30 bias -> exp underflows to 0.
    m = jnp.max(logits, axis=-1, keepdims=True)
    shifted = logits - m
    lse = jnp.log(jnp.sum(jnp.exp(shifted), axis=-1, keepdims=True))
    out_ref[...] = shifted - lse


# ----------------------------------------------------------------------------
# Parameter preparation (padding + bf16 cast of weights; biases stay f32)
# ----------------------------------------------------------------------------
def _prepare_params(params, in_pad, out_pad):
    f32, bf16 = jnp.float32, jnp.bfloat16

    def pad2(a, rows, cols, fill=0.0):
        a = jnp.asarray(a, f32)
        r, c = a.shape
        return jnp.pad(a, ((0, rows - r), (0, cols - c)), constant_values=fill)

    w1 = pad2(params["w1"], in_pad, 512).astype(bf16)
    b1 = jnp.asarray(params["b1"], f32)
    w2 = jnp.asarray(params["w2"], f32).astype(bf16)
    b2 = jnp.asarray(params["b2"], f32)
    w3 = jnp.asarray(params["w3"], f32).astype(bf16)
    b3 = jnp.asarray(params["b3"], f32)
    w4 = pad2(params["w4"], 128, 128).astype(bf16)            # 128 x (64 -> 128)
    b4 = pad2(params["b4"], 1, 128)                           # zero fill (ReLU-safe)
    w5 = pad2(params["w5"], 128, 128).astype(bf16)            # (64 -> 128) x (32 -> 128)
    b5 = pad2(params["b5"], 1, 128)                           # zero fill (ReLU-safe)
    w6 = pad2(params["w6"], 128, out_pad).astype(bf16)        # (32 -> 128) x (C -> out_pad)
    b6 = pad2(params["b6"], 1, out_pad, fill=_NEG)            # padded classes -> -inf-ish
    return [w1, b1, w2, b2, w3, b3, w4, b4, w5, b5, w6, b6]


# ----------------------------------------------------------------------------
# Wrappers
# ----------------------------------------------------------------------------
def ann_forward_batch(x2d, params, tm=None):
    """Batched forward: x2d of shape (B, input_size) -> (B, num_classes) log-probs."""
    x2d = jnp.asarray(x2d, jnp.float32)
    B, input_size = x2d.shape
    num_classes = params["b6"].shape[-1]

    in_pad = _round_up(input_size, _LANE)
    out_pad = _round_up(num_classes, _LANE)

    if tm is None:
        # >=2 grid steps whenever B allows it (shards the "parallel" batch axis
        # across both v7x TensorCores); cap at 512 rows (multiple of 256, fills
        # the v6e/v7x MXU, VMEM-safe on v7x). 16-row alignment for bf16 tiles.
        half = _round_up(pl.cdiv(_round_up(B, 16), 2), 16)
        tm = min(512, max(16, half))
    tm = max(16, _round_up(tm, 16))
    b_pad = _round_up(B, tm)

    # bf16 input: halves per-row HBM traffic and the x double-buffer VMEM.
    x_p = jnp.pad(x2d, ((0, b_pad - B), (0, in_pad - input_size))).astype(jnp.bfloat16)
    flat = _prepare_params(params, in_pad, out_pad)

    # Explicit VMEM budget: 2x x-tile + 2x out-tile (double-buffered)
    # + 1x weights/biases (Buffered(1)) + live activations + headroom.
    xbytes = tm * in_pad * 2
    obytes = tm * out_pad * 4
    wbytes = sum(int(a.size) * a.dtype.itemsize for a in flat)
    act_bytes = tm * (512 + 256 + 128 * 3 + out_pad) * 4
    budget = 2 * xbytes + 2 * obytes + wbytes + act_bytes + 8 * _MIB
    vmem_limit = int(min(max(budget, 16 * _MIB), 64 * _MIB))

    def resident_spec(arr):
        # Constant index_map -> block is resident across the whole grid; a
        # single buffer is enough (no double-buffering of constant weights).
        nd = arr.ndim
        return pl.BlockSpec(arr.shape, lambda i, nd=nd: (0,) * nd,
                            pipeline_mode=pl.Buffered(1))

    out = pl.pallas_call(
        _ann_kernel,
        out_shape=jax.ShapeDtypeStruct((b_pad, out_pad), jnp.float32),
        grid=(b_pad // tm,),
        in_specs=[pl.BlockSpec((tm, in_pad), lambda i: (i, 0))]
                 + [resident_spec(a) for a in flat],
        out_specs=pl.BlockSpec((tm, out_pad), lambda i: (i, 0)),
        compiler_params=pltpu.CompilerParams(
            dimension_semantics=("parallel",),
            vmem_limit_bytes=vmem_limit),
    )(x_p, *flat)

    return out[:B, :num_classes]


def ann_forward(x, params):
    """PyTorch-equivalent semantics: x is flattened to (1, -1) like x.view(1, -1)."""
    x = jnp.asarray(x, jnp.float32).reshape(1, -1)
    return ann_forward_batch(x, params)


# ----------------------------------------------------------------------------
# Reference (mirrors kernel precision: bf16 matmul operands, f32 accumulation)
# ----------------------------------------------------------------------------
def ann_reference(x2d, params):
    h = jnp.asarray(x2d, jnp.float32)
    for i in range(1, 7):
        w = jnp.asarray(params[f"w{i}"], jnp.float32).astype(jnp.bfloat16)
        b = jnp.asarray(params[f"b{i}"], jnp.float32)
        z = jnp.dot(h.astype(jnp.bfloat16), w,
                    preferred_element_type=jnp.float32) + b
        h = jnp.maximum(z, 0.0) if i < 6 else z
    return jax.nn.log_softmax(h, axis=-1)


# ----------------------------------------------------------------------------
# Init (mimics nn.Linear's U(-1/sqrt(fan_in), 1/sqrt(fan_in)))
# ----------------------------------------------------------------------------
def init_params(input_size, num_classes, key):
    sizes = [input_size, 512, 256, 128, 64, 32, num_classes]
    params = {}
    for i in range(6):
        fan_in, fan_out = sizes[i], sizes[i + 1]
        key, kw, kb = jax.random.split(key, 3)
        bound = 1.0 / jnp.sqrt(fan_in)
        # stored as (in, out) so the kernel computes h @ W + b
        params[f"w{i + 1}"] = jax.random.uniform(
            kw, (fan_in, fan_out), jnp.float32, -bound, bound)
        params[f"b{i + 1}"] = jax.random.uniform(
            kb, (1, fan_out), jnp.float32, -bound, bound)
    return params


if __name__ == "__main__":
    key = jax.random.PRNGKey(0)
    k_x, k_p, k_b = jax.random.split(key, 3)

    # Small example: x of shape (2, 128) -> flattened input_size = 256
    x = jax.random.normal(k_x, (2, 128), jnp.float32)
    input_size = x.size
    num_classes = 10
    params = init_params(input_size, num_classes, k_p)

    # 1) PyTorch-equivalent single-sample path (x.view(1, -1)).
    out1 = jax.block_until_ready(ann_forward(x, params))
    ref1 = ann_reference(x.reshape(1, -1), params)
    assert out1.shape == (1, num_classes)
    assert jnp.allclose(jnp.sum(jnp.exp(out1), axis=-1), 1.0, atol=1e-3)
    assert jnp.allclose(out1, ref1, atol=1e-2, rtol=1e-2)

    # 2) Batched throughput path (grid has 2 steps: exercises pipelining / 2-TC path).
    xb = jax.random.normal(k_b, (64, input_size), jnp.float32)
    outb = jax.block_until_ready(ann_forward_batch(xb, params))
    refb = ann_reference(xb, params)
    assert outb.shape == (64, num_classes)
    assert jnp.allclose(jnp.sum(jnp.exp(outb), axis=-1), 1.0, atol=1e-3)
    assert jnp.allclose(outb, refb, atol=1e-2, rtol=1e-2)

    print("KERNEL_OK")
</pallas_src>

<mosaic_0001>
module attributes {stable_mosaic.version = 11 : i64} {
  func.func @_ann_kernel(%arg0: i32, %arg1: memref<16x256xbf16, #tpu.memory_space<vmem>>, %arg2: memref<256x512xbf16, #tpu.memory_space<vmem>>, %arg3: memref<1x512xf32, #tpu.memory_space<vmem>>, %arg4: memref<512x256xbf16, #tpu.memory_space<vmem>>, %arg5: memref<1x256xf32, #tpu.memory_space<vmem>>, %arg6: memref<256x128xbf16, #tpu.memory_space<vmem>>, %arg7: memref<1x128xf32, #tpu.memory_space<vmem>>, %arg8: memref<128x128xbf16, #tpu.memory_space<vmem>>, %arg9: memref<1x128xf32, #tpu.memory_space<vmem>>, %arg10: memref<128x128xbf16, #tpu.memory_space<vmem>>, %arg11: memref<1x128xf32, #tpu.memory_space<vmem>>, %arg12: memref<128x128xbf16, #tpu.memory_space<vmem>>, %arg13: memref<1x128xf32, #tpu.memory_space<vmem>>, %arg14: memref<16x128xf32, #tpu.memory_space<vmem>>) attributes {dimension_semantics = [#tpu.dimension_semantics<parallel>], iteration_bounds = array<i64: 1>, scalar_prefetch = 0 : i64, scratch_operands = 0 : i64, tpu.core_type = #tpu.core_type<tc>, window_params = [{transform_indices = @transform_0, window_bounds = array<i64: 16, 256>}, {pipeline_mode = #tpu.pipeline_mode<synchronous>, transform_indices = @transform_1, window_bounds = array<i64: 256, 512>}, {pipeline_mode = #tpu.pipeline_mode<synchronous>, transform_indices = @transform_2, window_bounds = array<i64: 1, 512>}, {pipeline_mode = #tpu.pipeline_mode<synchronous>, transform_indices = @transform_3, window_bounds = array<i64: 512, 256>}, {pipeline_mode = #tpu.pipeline_mode<synchronous>, transform_indices = @transform_4, window_bounds = array<i64: 1, 256>}, {pipeline_mode = #tpu.pipeline_mode<synchronous>, transform_indices = @transform_5, window_bounds = array<i64: 256, 128>}, {pipeline_mode = #tpu.pipeline_mode<synchronous>, transform_indices = @transform_6, window_bounds = array<i64: 1, 128>}, {pipeline_mode = #tpu.pipeline_mode<synchronous>, transform_indices = @transform_7, window_bounds = array<i64: 128, 128>}, {pipeline_mode = #tpu.pipeline_mode<synchronous>, transform_indices = @transform_8, window_bounds = array<i64: 1, 128>}, {pipeline_mode = #tpu.pipeline_mode<synchronous>, transform_indices = @transform_9, window_bounds = array<i64: 128, 128>}, {pipeline_mode = #tpu.pipeline_mode<synchronous>, transform_indices = @transform_10, window_bounds = array<i64: 1, 128>}, {pipeline_mode = #tpu.pipeline_mode<synchronous>, transform_indices = @transform_11, window_bounds = array<i64: 128, 128>}, {pipeline_mode = #tpu.pipeline_mode<synchronous>, transform_indices = @transform_12, window_bounds = array<i64: 1, 128>}, {transform_indices = @transform_13, window_bounds = array<i64: 16, 128>}]} {
    %c0 = arith.constant 0 : index
    %c0_0 = arith.constant 0 : index
    %0 = vector.load %arg1[%c0, %c0_0] : memref<16x256xbf16, #tpu.memory_space<vmem>>, vector<16x256xbf16>
    %c0_1 = arith.constant 0 : index
    %c0_2 = arith.constant 0 : index
    %1 = vector.load %arg2[%c0_1, %c0_2] : memref<256x512xbf16, #tpu.memory_space<vmem>>, vector<256x512xbf16>
    %cst = arith.constant dense<0.000000e+00> : vector<16x512xf32>
    %2 = tpu.matmul %0, %1, %cst {dimension_numbers = #tpu.dot_dimension_numbers<[1], [0], [0], [1], [0, 0, 1, 1], [], []>} : vector<16x256xbf16>, vector<256x512xbf16>, vector<16x512xf32> -> vector<16x512xf32>
    %c0_3 = arith.constant 0 : index
    %c0_4 = arith.constant 0 : index
    %3 = vector.load %arg3[%c0_3, %c0_4] : memref<1x512xf32, #tpu.memory_space<vmem>>, vector<1x512xf32>
    %4 = vector.broadcast %3 : vector<1x512xf32> to vector<16x512xf32>
    %5 = arith.addf %2, %4 : vector<16x512xf32>
    %cst_5 = arith.constant 0.000000e+00 : f32
    %6 = vector.broadcast %cst_5 : f32 to vector<16x512xf32>
    %7 = arith.maximumf %5, %6 : vector<16x512xf32>
    %8 = arith.truncf %7 : vector<16x512xf32> to vector<16x512xbf16>
    %c0_6 = arith.constant 0 : index
    %c0_7 = arith.constant 0 : index
    %9 = vector.load %arg4[%c0_6, %c0_7] : memref<512x256xbf16, #tpu.memory_space<vmem>>, vector<512x256xbf16>
    %cst_8 = arith.constant dense<0.000000e+00> : vector<16x256xf32>
    %10 = tpu.matmul %8, %9, %cst_8 {dimension_numbers = #tpu.dot_dimension_numbers<[1], [0], [0], [1], [0, 0, 1, 1], [], []>} : vector<16x512xbf16>, vector<512x256xbf16>, vector<16x256xf32> -> vector<16x256xf32>
    %c0_9 = arith.constant 0 : index
    %c0_10 = arith.constant 0 : index
    %11 = vector.load %arg5[%c0_9, %c0_10] : memref<1x256xf32, #tpu.memory_space<vmem>>, vector<1x256xf32>
    %12 = vector.broadcast %11 : vector<1x256xf32> to vector<16x256xf32>
    %13 = arith.addf %10, %12 : vector<16x256xf32>
    %cst_11 = arith.constant 0.000000e+00 : f32
    %14 = vector.broadcast %cst_11 : f32 to vector<16x256xf32>
    %15 = arith.maximumf %13, %14 : vector<16x256xf32>
    %16 = arith.truncf %15 : vector<16x256xf32> to vector<16x256xbf16>
    %c0_12 = arith.constant 0 : index
    %c0_13 = arith.constant 0 : index
    %17 = vector.load %arg6[%c0_12, %c0_13] : memref<256x128xbf16, #tpu.memory_space<vmem>>, vector<256x128xbf16>
    %cst_14 = arith.constant dense<0.000000e+00> : vector<16x128xf32>
    %18 = tpu.matmul %16, %17, %cst_14 {dimension_numbers = #tpu.dot_dimension_numbers<[1], [0], [0], [1], [0, 0, 1, 1], [], []>} : vector<16x256xbf16>, vector<256x128xbf16>, vector<16x128xf32> -> vector<16x128xf32>
    %c0_15 = arith.constant 0 : index
    %c0_16 = arith.constant 0 : index
    %19 = vector.load %arg7[%c0_15, %c0_16] : memref<1x128xf32, #tpu.memory_space<vmem>>, vector<1x128xf32>
    %20 = vector.broadcast %19 : vector<1x128xf32> to vector<16x128xf32>
    %21 = arith.addf %18, %20 : vector<16x128xf32>
    %cst_17 = arith.constant 0.000000e+00 : f32
    %22 = vector.broadcast %cst_17 : f32 to vector<16x128xf32>
    %23 = arith.maximumf %21, %22 : vector<16x128xf32>
    %24 = arith.truncf %23 : vector<16x128xf32> to vector<16x128xbf16>
    %c0_18 = arith.constant 0 : index
    %c0_19 = arith.constant 0 : index
    %25 = vector.load %arg8[%c0_18, %c0_19] : memref<128x128xbf16, #tpu.memory_space<vmem>>, vector<128x128xbf16>
    %cst_20 = arith.constant dense<0.000000e+00> : vector<16x128xf32>
    %26 = tpu.matmul %24, %25, %cst_20 {dimension_numbers = #tpu.dot_dimension_numbers<[1], [0], [0], [1], [0, 0, 1, 1], [], []>} : vector<16x128xbf16>, vector<128x128xbf16>, vector<16x128xf32> -> vector<16x128xf32>
    %c0_21 = arith.constant 0 : index
    %c0_22 = arith.constant 0 : index
    %27 = vector.load %arg9[%c0_21, %c0_22] : memref<1x128xf32, #tpu.memory_space<vmem>>, vector<1x128xf32>
    %28 = vector.broadcast %27 : vector<1x128xf32> to vector<16x128xf32>
    %29 = arith.addf %26, %28 : vector<16x128xf32>
    %cst_23 = arith.constant 0.000000e+00 : f32
    %30 = vector.broadcast %cst_23 : f32 to vector<16x128xf32>
    %31 = arith.maximumf %29, %30 : vector<16x128xf32>
    %32 = arith.truncf %31 : vector<16x128xf32> to vector<16x128xbf16>
    %c0_24 = arith.constant 0 : index
    %c0_25 = arith.constant 0 : index
    %33 = vector.load %arg10[%c0_24, %c0_25] : memref<128x128xbf16, #tpu.memory_space<vmem>>, vector<128x128xbf16>
    %cst_26 = arith.constant dense<0.000000e+00> : vector<16x128xf32>
    %34 = tpu.matmul %32, %33, %cst_26 {dimension_numbers = #tpu.dot_dimension_numbers<[1], [0], [0], [1], [0, 0, 1, 1], [], []>} : vector<16x128xbf16>, vector<128x128xbf16>, vector<16x128xf32> -> vector<16x128xf32>
    %c0_27 = arith.constant 0 : index
    %c0_28 = arith.constant 0 : index
    %35 = vector.load %arg11[%c0_27, %c0_28] : memref<1x128xf32, #tpu.memory_space<vmem>>, vector<1x128xf32>
    %36 = vector.broadcast %35 : vector<1x128xf32> to vector<16x128xf32>
    %37 = arith.addf %34, %36 : vector<16x128xf32>
    %cst_29 = arith.constant 0.000000e+00 : f32
    %38 = vector.broadcast %cst_29 : f32 to vector<16x128xf32>
    %39 = arith.maximumf %37, %38 : vector<16x128xf32>
    %40 = arith.truncf %39 : vector<16x128xf32> to vector<16x128xbf16>
    %c0_30 = arith.constant 0 : index
    %c0_31 = arith.constant 0 : index
    %41 = vector.load %arg12[%c0_30, %c0_31] : memref<128x128xbf16, #tpu.memory_space<vmem>>, vector<128x128xbf16>
    %cst_32 = arith.constant dense<0.000000e+00> : vector<16x128xf32>
    %42 = tpu.matmul %40, %41, %cst_32 {dimension_numbers = #tpu.dot_dimension_numbers<[1], [0], [0], [1], [0, 0, 1, 1], [], []>} : vector<16x128xbf16>, vector<128x128xbf16>, vector<16x128xf32> -> vector<16x128xf32>
    %c0_33 = arith.constant 0 : index
    %c0_34 = arith.constant 0 : index
    %43 = vector.load %arg13[%c0_33, %c0_34] : memref<1x128xf32, #tpu.memory_space<vmem>>, vector<1x128xf32>
    %44 = vector.broadcast %43 : vector<1x128xf32> to vector<16x128xf32>
    %45 = arith.addf %42, %44 : vector<16x128xf32>
    %cst_35 = arith.constant dense<0xFF800000> : vector<16xf32>
    %46 = vector.multi_reduction <maximumf>, %45, %cst_35 [1] : vector<16x128xf32> to vector<16xf32>
    %47 = vector.shape_cast %46 : vector<16xf32> to vector<16x1xf32>
    %48 = vector.broadcast %47 : vector<16x1xf32> to vector<16x128xf32>
    %49 = arith.subf %45, %48 : vector<16x128xf32>
    %50 = math.exp %49 : vector<16x128xf32>
    %cst_36 = arith.constant dense<0.000000e+00> : vector<16xf32>
    %51 = vector.multi_reduction <add>, %50, %cst_36 [1] : vector<16x128xf32> to vector<16xf32>
    %52 = vector.shape_cast %51 : vector<16xf32> to vector<16x1xf32>
    %53 = math.log %52 : vector<16x1xf32>
    %54 = vector.broadcast %53 : vector<16x1xf32> to vector<16x128xf32>
    %55 = arith.subf %49, %54 : vector<16x128xf32>
    %c0_37 = arith.constant 0 : index
    %c0_38 = arith.constant 0 : index
    %56 = vector.load %arg14[%c0_37, %c0_38] : memref<16x128xf32, #tpu.memory_space<vmem>>, vector<16x128xf32>
    tpu.vector_store %arg14[%c0_37, %c0_38], %55 {strides = array<i32>} : memref<16x128xf32, #tpu.memory_space<vmem>>, vector<16x128xf32>,
    return
  }
  func.func @transform_0(%arg0: i32) -> (i32, i32) {
    %c0_i32 = arith.constant 0 : i32
    %c0_i32_0 = arith.constant 0 : i32
    return %arg0, %c0_i32 : i32, i32
  }
  func.func @transform_1(%arg0: i32) -> (i32, i32) {
    %c0_i32 = arith.constant 0 : i32
    %c0_i32_0 = arith.constant 0 : i32
    %c0_i32_1 = arith.constant 0 : i32
    return %c0_i32, %c0_i32_0 : i32, i32
  }
  func.func @transform_2(%arg0: i32) -> (i32, i32) {
    %c0_i32 = arith.constant 0 : i32
    %c0_i32_0 = arith.constant 0 : i32
    %c0_i32_1 = arith.constant 0 : i32
    return %c0_i32, %c0_i32_0 : i32, i32
  }
  func.func @transform_3(%arg0: i32) -> (i32, i32) {
    %c0_i32 = arith.constant 0 : i32
    %c0_i32_0 = arith.constant 0 : i32
    %c0_i32_1 = arith.constant 0 : i32
    return %c0_i32, %c0_i32_0 : i32, i32
  }
  func.func @transform_4(%arg0: i32) -> (i32, i32) {
    %c0_i32 = arith.constant 0 : i32
    %c0_i32_0 = arith.constant 0 : i32
    %c0_i32_1 = arith.constant 0 : i32
    return %c0_i32, %c0_i32_0 : i32, i32
  }
  func.func @transform_5(%arg0: i32) -> (i32, i32) {
    %c0_i32 = arith.constant 0 : i32
    %c0_i32_0 = arith.constant 0 : i32
    %c0_i32_1 = arith.constant 0 : i32
    return %c0_i32, %c0_i32_0 : i32, i32
  }
  func.func @transform_6(%arg0: i32) -> (i32, i32) {
    %c0_i32 = arith.constant 0 : i32
    %c0_i32_0 = arith.constant 0 : i32
    %c0_i32_1 = arith.constant 0 : i32
    return %c0_i32, %c0_i32_0 : i32, i32
  }
  func.func @transform_7(%arg0: i32) -> (i32, i32) {
    %c0_i32 = arith.constant 0 : i32
    %c0_i32_0 = arith.constant 0 : i32
    %c0_i32_1 = arith.constant 0 : i32
    return %c0_i32, %c0_i32_0 : i32, i32
  }
  func.func @transform_8(%arg0: i32) -> (i32, i32) {
    %c0_i32 = arith.constant 0 : i32
    %c0_i32_0 = arith.constant 0 : i32
    %c0_i32_1 = arith.constant 0 : i32
    return %c0_i32, %c0_i32_0 : i32, i32
  }
  func.func @transform_9(%arg0: i32) -> (i32, i32) {
    %c0_i32 = arith.constant 0 : i32
    %c0_i32_0 = arith.constant 0 : i32
    %c0_i32_1 = arith.constant 0 : i32
    return %c0_i32, %c0_i32_0 : i32, i32
  }
  func.func @transform_10(%arg0: i32) -> (i32, i32) {
    %c0_i32 = arith.constant 0 : i32
    %c0_i32_0 = arith.constant 0 : i32
    %c0_i32_1 = arith.constant 0 : i32
    return %c0_i32, %c0_i32_0 : i32, i32
  }
  func.func @transform_11(%arg0: i32) -> (i32, i32) {
    %c0_i32 = arith.constant 0 : i32
    %c0_i32_0 = arith.constant 0 : i32
    %c0_i32_1 = arith.constant 0 : i32
    return %c0_i32, %c0_i32_0 : i32, i32
  }
  func.func @transform_12(%arg0: i32) -> (i32, i32) {
    %c0_i32 = arith.constant 0 : i32
    %c0_i32_0 = arith.constant 0 : i32
    %c0_i32_1 = arith.constant 0 : i32
    return %c0_i32, %c0_i32_0 : i32, i32
  }
  func.func @transform_13(%arg0: i32) -> (i32, i32) {
    %c0_i32 = arith.constant 0 : i32
    %c0_i32_0 = arith.constant 0 : i32
    return %arg0, %c0_i32 : i32, i32
  }
}

</mosaic_0001>

<bundles_post_ra>
// kernel: tpu_custom_call.1
= control target key start
LH: loop header
LB: loop body
LE: loop exit
PB: predicated region body
PF: predicated region fallthrough
CT: control target
= control target key end

     0   :  { %18 = vsyncpa [#allocation3], 0  ;;  %s2650_s0 = inlined_call_operand.hbm [shape: bf16[16,256], index: 0, kind: input, shape index: {}]   ;;  %s2651_s1 = inlined_call_operand.hbm [shape: bf16[256,512], index: 1, kind: input, shape index: {}]   ;;  %s2652_s2 = inlined_call_operand.hbm [shape: f32[1,512], index: 2, kind: input, shape index: {}]   ;;  %s2653_s3 = inlined_call_operand.hbm [shape: bf16[512,256], index: 3, kind: input, shape index: {}]   ;;  %s2654_s4 = inlined_call_operand.vmem [shape: f32[1,256], index: 4, kind: input, shape index: {}]   ;;  %s2655_s5 = inlined_call_operand.hbm [shape: bf16[256,128], index: 5, kind: input, shape index: {}]   ;;  %s2656_s6 = inlined_call_operand.vmem [shape: f32[1,128], index: 6, kind: input, shape index: {}]   ;;  %s2657_s7 = inlined_call_operand.hbm [shape: bf16[128,128], index: 7, kind: input, shape index: {}]   ;;  %s2658_s8 = inlined_call_operand.vmem [shape: f32[1,128], index: 8, kind: input, shape index: {}]   ;;  %s2659_s9 = inlined_call_operand.hbm [shape: bf16[128,128], index: 9, kind: input, shape index: {}]   ;;  %s2660_s10 = inlined_call_operand.vmem [shape: f32[1,128], index: 10, kind: input, shape index: {}]   ;;  %s2661_s11 = inlined_call_operand.hbm [shape: bf16[128,128], index: 11, kind: input, shape index: {}]   ;;  %s2662_s12 = inlined_call_operand.vmem [shape: f32[1,128], index: 12, kind: input, shape index: {}]   ;;  %s2663_s13 = inlined_call_operand.hbm [shape: f32[16,128], index: 13, kind: output, shape index: {}]  }
   0x1   :  { %19 = vsyncpa [#allocation6], 0 }
   0x2   :  { %20 = vsyncpa [#allocation9], 0 }
   0x3   :  { %21 = vsyncpa [#allocation12], 0 }
   0x4   :  { %22 = vsyncpa [#allocation15], 0 }
   0x5   :  { %23 = vsyncpa [#allocation4], 0  ;;  %s2456_s25 = smov [#allocation5]  }
   0x6   :  { %s41_s26 = sshll.u32 %s2456_s25, 4  ;;  %s42_s26 = int_to_ptr.vmem [resolvable:$true] %s41_s26 }
   0x7   :  { %s2272_s27 = scalar_lea.vmem %s42_s26, 8192  ;;  %p2277_p1 = scmp.lt.s32.totalorder %s42_s26, %s42_s26 }
   0x8   :  { %p2273_p0 = scmp.ne.s32.totalorder %s42_s26, %s2272_s27  ;;  %p2278_p2 = scmp.lt.s32.totalorder %s2272_s27, %s2272_s27 }
   0xa   :  { %p2279_p3 = por %p2278_p2, %p2277_p1 }
   0xc   :  { %p2280_p4 = pnand %p2279_p3, %p2273_p0 }
   0xe   :  { %2283 = shalt.err (!%p2280_p4)
}
   0xf   :  { %s2457_s28 = smov 256   ;;  %s2458_s29 = smov 16  }
  0x10   :  { %47 = dma.hbm_to_vmem [thread:$0]  %s2651_s1, 8192, %s42_s26, [#allocation6], %s2457_s28, %s2457_s28, %s2458_s29  }
  0x11   :  { %s2459_s15 = smov [#allocation8]  }
  0x12   :  { %s63_s16 = sshll.u32 %s2459_s15, 4  ;;  %s64_s16 = int_to_ptr.vmem [resolvable:$true] %s63_s16 }
  0x13   :  { %s2292_s17 = scalar_lea.vmem %s64_s16, 8192  ;;  %p2297_p6 = scmp.lt.s32.totalorder %s64_s16, %s64_s16 }
  0x14   :  { %p2293_p5 = scmp.ne.s32.totalorder %s64_s16, %s2292_s17  ;;  %p2298_p7 = scmp.lt.s32.totalorder %s2292_s17, %s2292_s17 }
  0x16   :  { %p2299_p8 = por %p2298_p7, %p2297_p6 }
  0x18   :  { %p2300_p9 = pnand %p2299_p8, %p2293_p5 }
  0x1a   :  { %2303 = shalt.err (!%p2300_p9)
}
  0x1b   :  { %s2460_s18 = smov 128   ;;  %s2461_s19 = smov 8  }
  0x1c   :  { %69 = dma.hbm_to_vmem [thread:$0]  %s2653_s3, 8192, %s64_s16, [#allocation9], %s2460_s18, %s2460_s18, %s2461_s19  }
  0x1d   :  { %s2462_s1 = smov [#allocation11]   ;;  %s2463_s23 = smov [#allocation2]  }
  0x1e   :  { %s91_s22 = sshll.u32 %s2462_s1, 4  ;;  %s29_s24 = sshll.u32 %s2463_s23, 4  ;;  %s92_s22 = int_to_ptr.vmem [resolvable:$true] %s91_s22  ;;  %s30_s24 = int_to_ptr.vmem [resolvable:$true] %s29_s24 }
  0x1f   :  { %s2312_s25 = scalar_lea.vmem %s92_s22, 1024  ;;  %p2317_p11 = scmp.lt.s32.totalorder %s92_s22, %s92_s22 }
  0x20   :  { %p2313_p10 = scmp.ne.s32.totalorder %s92_s22, %s2312_s25  ;;  %p2318_p12 = scmp.lt.s32.totalorder %s2312_s25, %s2312_s25 }
  0x22   :  { %p2319_p13 = por %p2318_p12, %p2317_p11 }
  0x24   :  { %p2320_p0 = pnand %p2319_p13, %p2313_p10 }
  0x26   :  { %2323 = shalt.err (!%p2320_p0)
}
  0x27   :  { %s2464_s26 = smov 64   ;;  %s2465_s27 = smov 4  }
  0x28   :  { %97 = dma.hbm_to_vmem [thread:$0]  %s2657_s7, 1024, %s92_s22, [#allocation12], %s2464_s26, %s2464_s26, %s2465_s27  }
  0x29   :  { %s2332_s29 = scalar_lea.vmem %s30_s24, 256  ;;  %p2337_p2 = scmp.lt.s32.totalorder %s30_s24, %s30_s24 }
  0x2a   :  { %p2333_p1 = scmp.ne.s32.totalorder %s30_s24, %s2332_s29  ;;  %p2338_p3 = scmp.lt.s32.totalorder %s2332_s29, %s2332_s29 }
  0x2c   :  { %p2339_p4 = por %p2338_p3, %p2337_p2 }
  0x2e   :  { %p2340_p5 = pnand %p2339_p4, %p2333_p1 }
  0x30   :  { %2343 = shalt.err (!%p2340_p5)
}
  0x31   :  { %35 = dma.hbm_to_vmem [thread:$0]  %s2650_s0, 256, %s30_s24, [#allocation3], %s2460_s18, %s2460_s18, %s2461_s19  }
  0x32   :  { %s2466_s15 = smov [#allocation7]   ;;  %s2467_s17 = smov [#allocation10]  }
  0x33   :  { %s54_s16 = sshll.u32 %s2466_s15, 4  ;;  %s77_s20 = sshll.u32 %s2467_s17, 4  ;;  %s55_s16 = int_to_ptr.vmem [resolvable:$true] %s54_s16  ;;  %s78_s20 = int_to_ptr.vmem [resolvable:$true] %s77_s20 }
  0x34   :  { %s2352_s7 = scalar_lea.vmem %s55_s16, 64  ;;  %p2357_p7 = scmp.lt.s32.totalorder %s55_s16, %s55_s16 }
  0x35   :  { %p2353_p6 = scmp.ne.s32.totalorder %s55_s16, %s2352_s7  ;;  %p2358_p8 = scmp.lt.s32.totalorder %s2352_s7, %s2352_s7 }
  0x37   :  { %p2359_p9 = por %p2358_p8, %p2357_p7 }
  0x39   :  { %p2360_p10 = pnand %p2359_p9, %p2353_p6 }
  0x3b   :  { %2363 = shalt.err (!%p2360_p10)
}
  0x3c   :  { %57 = dma.hbm_to_vmem [thread:$0]  %s2652_s2, 64, %s55_s16, [#allocation6]  }
  0x3d   :  { %s2372_s22 = scalar_lea.vmem %s78_s20, 2048  ;;  %p2377_p12 = scmp.lt.s32.totalorder %s78_s20, %s78_s20 }
  0x3e   :  { %p2373_p11 = scmp.ne.s32.totalorder %s78_s20, %s2372_s22  ;;  %p2378_p13 = scmp.lt.s32.totalorder %s2372_s22, %s2372_s22 }
  0x40   :  { %p2379_p0 = por %p2378_p13, %p2377_p12 }
  0x42   :  { %p2380_p1 = pnand %p2379_p0, %p2373_p11 }
  0x44   :  { %2383 = shalt.err (!%p2380_p1)
}
  0x45   :  { %83 = dma.hbm_to_vmem [thread:$0]  %s2655_s5, 2048, %s78_s20, [#allocation9], %s2464_s26, %s2464_s26, %s2465_s27  }
  0x46   :  { %s2468_s24 = smov [#allocation13]   ;;  %s2469_s28 = smov [#allocation14]  }
  0x47   :  { %s105_s25 = sshll.u32 %s2468_s24, 4  ;;  %s119_s3 = sshll.u32 %s2469_s28, 4  ;;  %s106_s25 = int_to_ptr.vmem [resolvable:$true] %s105_s25  ;;  %s120_s3 = int_to_ptr.vmem [resolvable:$true] %s119_s3 }
  0x48   :  { %s2392_s2 = scalar_lea.vmem %s106_s25, 1024  ;;  %p2397_p3 = scmp.lt.s32.totalorder %s106_s25, %s106_s25 }
  0x49   :  { %p2393_p2 = scmp.ne.s32.totalorder %s106_s25, %s2392_s2  ;;  %p2398_p4 = scmp.lt.s32.totalorder %s2392_s2, %s2392_s2 }
  0x4b   :  { %p2399_p5 = por %p2398_p4, %p2397_p3 }
  0x4d   :  { %p2400_p6 = pnand %p2399_p5, %p2393_p2 }
  0x4f   :  { %2403 = shalt.err (!%p2400_p6)
}
  0x50   :  { %111 = dma.hbm_to_vmem [thread:$0]  %s2659_s9, 1024, %s106_s25, [#allocation12], %s2464_s26, %s2464_s26, %s2465_s27  }
  0x51   :  { %s2412_s5 = scalar_lea.vmem %s120_s3, 1024  ;;  %p2417_p8 = scmp.lt.s32.totalorder %s120_s3, %s120_s3 }
  0x52   :  { %p2413_p7 = scmp.ne.s32.totalorder %s120_s3, %s2412_s5  ;;  %p2418_p9 = scmp.lt.s32.totalorder %s2412_s5, %s2412_s5 }
  0x54   :  { %p2419_p10 = por %p2418_p9, %p2417_p8 }
  0x56   :  { %p2420_p11 = pnand %p2419_p10, %p2413_p7 }
  0x58   :  { %2423 = shalt.err (!%p2420_p11)
}
  0x59   :  { %125 = dma.hbm_to_vmem [thread:$0]  %s2661_s11, 1024, %s120_s3, [#allocation15], %s2464_s26, %s2464_s26, %s2465_s27  }
  0x5a   :  { %2444 = dma.done.wait [#allocation3], 256  }
  0x5b   :  { %2445 = vsyncadd [#allocation3], 4294967040 }
  0x5c   :  { %2446 = dma.done.wait [#allocation6], 8256  }
  0x5d   :  { %2447 = vsyncadd [#allocation6], 4294959040 }
  0x5e   :  { %2448 = dma.done.wait [#allocation9], 10240  }
  0x5f   :  { %2449 = vsyncadd [#allocation9], 4294957056 }
  0x60   :  { %2450 = dma.done.wait [#allocation12], 2048  }
  0x61   :  { %2451 = vsyncadd [#allocation12], 4294965248 }
  0x62   :  { %2452 = dma.done.wait [#allocation15], 1024  }
  0x63   :  { %2453 = vsyncadd [#allocation15], 4294966272  ;;  %v2021_v0 = vld [vmem:[#allocation5 + $0xe4] ss:$16 sps:$4 sm:$0xff]   ;;  %v2023_v1 = vld [vmem:[#allocation5 + $0xec] ss:$16 sps:$4 sm:$0xff]  }
  0x64   :  { %571 = vmatprep.subr.bf16.mxu0 %v2021_v0  ;;  %v2025_v2 = vld [vmem:[#allocation5 + $0xe0] ss:$16 sps:$4 sm:$0xff]   ;;  %v2026_v3 = vld [vmem:[#allocation5 + $0xe8] ss:$16 sps:$4 sm:$0xff]   ;;  %614 = vmatprep.subr.bf16.mxu1 %v2023_v1  ;;  %v2027_v4 = vld [vmem:[#allocation5 + $0xc4] ss:$16 sps:$4 sm:$0xff]  }
  0x65   :  { %572 = vmatpush1.bf16.msra.mxu0 %v2025_v2  ;;  %615 = vmatpush1.bf16.msra.mxu1 %v2026_v3  ;;  %v2029_v5 = vld [vmem:[#allocation5 + $0xcc] ss:$16 sps:$4 sm:$0xff]   ;;  %v2031_v6 = vld [vmem:[#allocation5 + $0xc0] ss:$16 sps:$4 sm:$0xff]   ;;  %v2032_v7 = vld [vmem:[#allocation5 + $0xc8] ss:$16 sps:$4 sm:$0xff]  }
  0x66   :  { %573 = vmatprep.subr.bf16.mxu0 %v2027_v4  ;;  %616 = vmatprep.subr.bf16.mxu1 %v2029_v5  ;;  %v2033_v8 = vld [vmem:[#allocation5 + $0xa4] ss:$16 sps:$4 sm:$0xff]   ;;  %v2035_v9 = vld [vmem:[#allocation5 + $0xac] ss:$16 sps:$4 sm:$0xff]   ;;  %v2037_v10 = vld [vmem:[#allocation5 + $0xa0] ss:$16 sps:$4 sm:$0xff]  }
  0x67   :  { %v2038_v11 = vld [vmem:[#allocation5 + $0xa8] ss:$16 sps:$4 sm:$0xff]   ;;  %v2039_v12 = vld [vmem:[#allocation5 + $0x84] ss:$16 sps:$4 sm:$0xff]   ;;  %v2041_v13 = vld [vmem:[#allocation5 + $0x8c] ss:$16 sps:$4 sm:$0xff]  }
  0x68   :  { %v2043_v14 = vld [vmem:[#allocation5 + $0x80] ss:$16 sps:$4 sm:$0xff]   ;;  %v2044_v15 = vld [vmem:[#allocation5 + $0x88] ss:$16 sps:$4 sm:$0xff]   ;;  %v2045_v16 = vld [vmem:[#allocation5 + $0x64] ss:$16 sps:$4 sm:$0xff]  }
  0x69   :  { %574 = vmatpush1.bf16.msra.mxu0 %v2031_v6  ;;  %617 = vmatpush1.bf16.msra.mxu1 %v2032_v7  ;;  %v2047_v17 = vld [vmem:[#allocation5 + $0x6c] ss:$16 sps:$4 sm:$0xff]   ;;  %v2049_v18 = vld [vmem:[#allocation5 + $0x60] ss:$16 sps:$4 sm:$0xff]   ;;  %v2050_v19 = vld [vmem:[#allocation5 + $0x68] ss:$16 sps:$4 sm:$0xff]  }
  0x6a   :  { %575 = vmatprep.subr.bf16.mxu0 %v2033_v8  ;;  %618 = vmatprep.subr.bf16.mxu1 %v2035_v9  ;;  %v2051_v20 = vld [vmem:[#allocation5 + $0x44] ss:$16 sps:$4 sm:$0xff]   ;;  %v2053_v21 = vld [vmem:[#allocation5 + $0x4c] ss:$16 sps:$4 sm:$0xff]   ;;  %v2055_v22 = vld [vmem:[#allocation5 + $0x40] ss:$16 sps:$4 sm:$0xff]  }
  0x6b   :  { %v2056_v23 = vld [vmem:[#allocation5 + $0x48] ss:$16 sps:$4 sm:$0xff]   ;;  %v2057_v24 = vld [vmem:[#allocation5 + $0x24] ss:$16 sps:$4 sm:$0xff]   ;;  %v2059_v25 = vld [vmem:[#allocation5 + $0x2c] ss:$16 sps:$4 sm:$0xff]  }
  0x6c   :  { %v2061_v26 = vld [vmem:[#allocation5 + $0x20] ss:$16 sps:$4 sm:$0xff]   ;;  %v2062_v27 = vld [vmem:[#allocation5 + $0x28] ss:$16 sps:$4 sm:$0xff]   ;;  %v2063_v28 = vld [vmem:[#allocation5 + $0x4] ss:$16 sps:$4 sm:$0xff]  }
  0x6d   :  { %576 = vmatpush1.bf16.msra.mxu0 %v2037_v10  ;;  %619 = vmatpush1.bf16.msra.mxu1 %v2038_v11  ;;  %v2065_v29 = vld [vmem:[#allocation5 + $0xc] ss:$16 sps:$4 sm:$0xff]   ;;  %v2067_v30 = vld [vmem:[#allocation5] ss:$16 sps:$4 sm:$0xff]   ;;  %v2068_v31 = vld [vmem:[#allocation5 + $0x8] ss:$16 sps:$4 sm:$0xff]  }
  0x6e   :  { %577 = vmatprep.subr.bf16.mxu0 %v2039_v12  ;;  %620 = vmatprep.subr.bf16.mxu1 %v2041_v13  ;;  %v2069_v32 = vld [vmem:[#allocation5 + $0x1e4] ss:$16 sps:$4 sm:$0xff]   ;;  %v2071_v33 = vld [vmem:[#allocation5 + $0x1ec] ss:$16 sps:$4 sm:$0xff]   ;;  %v2073_v34 = vld [vmem:[#allocation5 + $0x1e0] ss:$16 sps:$4 sm:$0xff]  }
  0x6f   :  { %v2074_v35 = vld [vmem:[#allocation5 + $0x1e8] ss:$16 sps:$4 sm:$0xff]   ;;  %v2075_v36 = vld [vmem:[#allocation5 + $0x1c4] ss:$16 sps:$4 sm:$0xff]   ;;  %v2077_v37 = vld [vmem:[#allocation5 + $0x1cc] ss:$16 sps:$4 sm:$0xff]  }
  0x70   :  { %v2079_v38 = vld [vmem:[#allocation5 + $0x1c0] ss:$16 sps:$4 sm:$0xff]   ;;  %v2080_v39 = vld [vmem:[#allocation5 + $0x1c8] ss:$16 sps:$4 sm:$0xff]   ;;  %v2081_v40 = vld [vmem:[#allocation5 + $0x1a4] ss:$16 sps:$4 sm:$0xff]  }
  0x71   :  { %578 = vmatpush1.bf16.msra.mxu0 %v2043_v14  ;;  %621 = vmatpush1.bf16.msra.mxu1 %v2044_v15  ;;  %v2083_v41 = vld [vmem:[#allocation5 + $0x1ac] ss:$16 sps:$4 sm:$0xff]   ;;  %v2085_v42 = vld [vmem:[#allocation5 + $0x1a0] ss:$16 sps:$4 sm:$0xff]   ;;  %v2086_v43 = vld [vmem:[#allocation5 + $0x1a8] ss:$16 sps:$4 sm:$0xff]  }
  0x72   :  { %579 = vmatprep.subr.bf16.mxu0 %v2045_v16  ;;  %622 = vmatprep.subr.bf16.mxu1 %v2047_v17  ;;  %v2087_v44 = vld [vmem:[#allocation5 + $0x184] ss:$16 sps:$4 sm:$0xff]   ;;  %v2089_v45 = vld [vmem:[#allocation5 + $0x18c] ss:$16 sps:$4 sm:$0xff]   ;;  %v2091_v46 = vld [vmem:[#allocation5 + $0x180] ss:$16 sps:$4 sm:$0xff]  }
  0x73   :  { %v2092_v47 = vld [vmem:[#allocation5 + $0x188] ss:$16 sps:$4 sm:$0xff]   ;;  %v2119_v48 = vld [vmem:[#allocation2 + $0x4] ss:$8 sps:$4 sm:$0xff]   ;;  %v2097_v51 = vld [vmem:[#allocation5 + $0x160] ss:$16 sps:$4 sm:$0xff]  }
  0x74   :  { %v2093_v49 = vld [vmem:[#allocation5 + $0x164] ss:$16 sps:$4 sm:$0xff]   ;;  %v2095_v50 = vld [vmem:[#allocation5 + $0x16c] ss:$16 sps:$4 sm:$0xff]   ;;  %603 = vmatprep.mubr.bf16.mxu0 %v2119_v48  ;;  %646 = vmatprep.mubr.bf16.mxu1 %v2119_v48  ;;  %v2098_v52 = vld [vmem:[#allocation5 + $0x168] ss:$16 sps:$4 sm:$0xff]  }
  0x75   :  { %580 = vmatpush1.bf16.msra.mxu0 %v2049_v18  ;;  %623 = vmatpush1.bf16.msra.mxu1 %v2050_v19  ;;  %v2099_v53 = vld [vmem:[#allocation5 + $0x144] ss:$16 sps:$4 sm:$0xff]   ;;  %v2101_v54 = vld [vmem:[#allocation5 + $0x14c] ss:$16 sps:$4 sm:$0xff]   ;;  %v2103_v55 = vld [vmem:[#allocation5 + $0x140] ss:$16 sps:$4 sm:$0xff]  }
  0x76   :  { %581 = vmatprep.subr.bf16.mxu0 %v2051_v20  ;;  %624 = vmatprep.subr.bf16.mxu1 %v2053_v21  ;;  %v2104_v56 = vld [vmem:[#allocation5 + $0x148] ss:$16 sps:$4 sm:$0xff]   ;;  %v2105_v57 = vld [vmem:[#allocation5 + $0x124] ss:$16 sps:$4 sm:$0xff]   ;;  %v2107_v58 = vld [vmem:[#allocation5 + $0x12c] ss:$16 sps:$4 sm:$0xff]  }
  0x77   :  { %v2109_v59 = vld [vmem:[#allocation5 + $0x120] ss:$16 sps:$4 sm:$0xff]   ;;  %v2110_v60 = vld [vmem:[#allocation5 + $0x128] ss:$16 sps:$4 sm:$0xff]   ;;  %v2111_v61 = vld [vmem:[#allocation5 + $0x104] ss:$16 sps:$4 sm:$0xff]  }
  0x78   :  { %v2113_v62 = vld [vmem:[#allocation5 + $0x10c] ss:$16 sps:$4 sm:$0xff]   ;;  %v2115_v63 = vld [vmem:[#allocation5 + $0x100] ss:$16 sps:$4 sm:$0xff]   ;;  %v2116_v0 = vld [vmem:[#allocation5 + $0x108] ss:$16 sps:$4 sm:$0xff]  }
  0x79   :  { %582 = vmatpush1.bf16.msra.mxu0 %v2055_v22  ;;  %625 = vmatpush1.bf16.msra.mxu1 %v2056_v23  ;;  %v2122_v1 = vld [vmem:[#allocation8 + $0x74] ss:$8 sps:$4 sm:$0xff]   ;;  %v2120_v4 = vld [vmem:[#allocation8 + $0x70] ss:$8 sps:$4 sm:$0xff]   ;;  %v2128_v6 = vld [vmem:[#allocation8 + $0x64] ss:$8 sps:$4 sm:$0xff]  }
  0x7a   :  { %583 = vmatprep.subr.bf16.mxu0 %v2057_v24  ;;  %626 = vmatprep.subr.bf16.mxu1 %v2059_v25  ;;  %v2125_v2 = vld [vmem:[#allocation8 + $0x174] ss:$8 sps:$4 sm:$0xff]   ;;  %v2123_v5 = vld [vmem:[#allocation8 + $0x170] ss:$8 sps:$4 sm:$0xff]   ;;  %v2131_v7 = vld [vmem:[#allocation8 + $0x164] ss:$8 sps:$4 sm:$0xff]  }
  0x7b   :  { %v2117_v3 = vld [vmem:[#allocation2] ss:$8 sps:$4 sm:$0xff]   ;;  %v2126_v8 = vld [vmem:[#allocation8 + $0x60] ss:$8 sps:$4 sm:$0xff]   ;;  %v2132_v12 = vld [vmem:[#allocation8 + $0x50] ss:$8 sps:$4 sm:$0xff]  }
  0x7c   :  { %v2129_v9 = vld [vmem:[#allocation8 + $0x160] ss:$8 sps:$4 sm:$0xff]   ;;  %v2134_v10 = vld [vmem:[#allocation8 + $0x54] ss:$8 sps:$4 sm:$0xff]   ;;  %v2135_v13 = vld [vmem:[#allocation8 + $0x150] ss:$8 sps:$4 sm:$0xff]  }
  0x7d   :  { %584 = vmatpush1.bf16.msra.mxu0 %v2061_v26  ;;  %627 = vmatpush1.bf16.msra.mxu1 %v2062_v27  ;;  %v2137_v11 = vld [vmem:[#allocation8 + $0x154] ss:$8 sps:$4 sm:$0xff]   ;;  %v2140_v14 = vld [vmem:[#allocation8 + $0x44] ss:$8 sps:$4 sm:$0xff]   ;;  %v2138_v16 = vld [vmem:[#allocation8 + $0x40] ss:$8 sps:$4 sm:$0xff]  }
  0x7e   :  { %585 = vmatprep.subr.bf16.mxu0 %v2063_v28  ;;  %628 = vmatprep.subr.bf16.mxu1 %v2065_v29  ;;  %v2143_v15 = vld [vmem:[#allocation8 + $0x144] ss:$8 sps:$4 sm:$0xff]   ;;  %v2141_v17 = vld [vmem:[#allocation8 + $0x140] ss:$8 sps:$4 sm:$0xff]   ;;  %v2146_v18 = vld [vmem:[#allocation8 + $0x34] ss:$8 sps:$4 sm:$0xff]  }
  0x7f   :  { %v2149_v19 = vld [vmem:[#allocation8 + $0x134] ss:$8 sps:$4 sm:$0xff]   ;;  %v2144_v20 = vld [vmem:[#allocation8 + $0x30] ss:$8 sps:$4 sm:$0xff]   ;;  %v2152_v22 = vld [vmem:[#allocation8 + $0x24] ss:$8 sps:$4 sm:$0xff]  }
  0x80   :  { %v2147_v21 = vld [vmem:[#allocation8 + $0x130] ss:$8 sps:$4 sm:$0xff]   ;;  %v2155_v23 = vld [vmem:[#allocation8 + $0x124] ss:$8 sps:$4 sm:$0xff]   ;;  %v2150_v24 = vld [vmem:[#allocation8 + $0x20] ss:$8 sps:$4 sm:$0xff]  }
  0x81   :  { %586 = vmatpush1.bf16.msra.mxu0 %v2067_v30  ;;  %629 = vmatpush1.bf16.msra.mxu1 %v2068_v31  ;;  %v2153_v25 = vld [vmem:[#allocation8 + $0x120] ss:$8 sps:$4 sm:$0xff]   ;;  %v2158_v26 = vld [vmem:[#allocation8 + $0x14] ss:$8 sps:$4 sm:$0xff]   ;;  %v2156_v28 = vld [vmem:[#allocation8 + $0x10] ss:$8 sps:$4 sm:$0xff]  }
  0x82   :  { %587 = vmatprep.subr.bf16.mxu0 %v2069_v32  ;;  %630 = vmatprep.subr.bf16.mxu1 %v2071_v33  ;;  %v2161_v27 = vld [vmem:[#allocation8 + $0x114] ss:$8 sps:$4 sm:$0xff]   ;;  %v2159_v29 = vld [vmem:[#allocation8 + $0x110] ss:$8 sps:$4 sm:$0xff]   ;;  %v2164_v30 = vld [vmem:[#allocation8 + $0x4] ss:$8 sps:$4 sm:$0xff]  }
  0x83   :  { %v2167_v31 = vld [vmem:[#allocation8 + $0x104] ss:$8 sps:$4 sm:$0xff]   ;;  %v2162_v32 = vld [vmem:[#allocation8] ss:$8 sps:$4 sm:$0xff]   ;;  %vm2471_vm0 = vmmov 0  }
  0x84   :  { %v2165_v33 = vld [vmem:[#allocation8 + $0x100] ss:$8 sps:$4 sm:$0xff]  }
  0x85   :  { %588 = vmatpush2.bf16.msra.mxu0 %v2073_v34  ;;  %631 = vmatpush2.bf16.msra.mxu1 %v2074_v35  ;;  %v2170_v34 = vld [vmem:[#allocation8 + $0xf4] ss:$8 sps:$4 sm:$0xff]   ;;  %v2186_v48 = vld [vmem:[#allocation8 + $0xc0] ss:$8 sps:$4 sm:$0xff]  }
  0x86   :  { %589 = vmatprep.subr.bf16.mxu0 %v2075_v36  ;;  %632 = vmatprep.subr.bf16.mxu1 %v2077_v37  ;;  %v2173_v35 = vld [vmem:[#allocation8 + $0x1f4] ss:$8 sps:$4 sm:$0xff]   ;;  %v2168_v36 = vld [vmem:[#allocation8 + $0xf0] ss:$8 sps:$4 sm:$0xff]  }
  0x87   :  { %v2171_v37 = vld [vmem:[#allocation8 + $0x1f0] ss:$8 sps:$4 sm:$0xff]  }
  0x89   :  { %590 = vmatpush2.bf16.msra.mxu0 %v2079_v38  ;;  %633 = vmatpush2.bf16.msra.mxu1 %v2080_v39  ;;  %v2176_v38 = vld [vmem:[#allocation8 + $0xe4] ss:$8 sps:$4 sm:$0xff]  }
  0x8a   :  { %591 = vmatprep.subr.bf16.mxu0 %v2081_v40  ;;  %634 = vmatprep.subr.bf16.mxu1 %v2083_v41  ;;  %v2179_v39 = vld [vmem:[#allocation8 + $0x1e4] ss:$8 sps:$4 sm:$0xff]   ;;  %v2174_v40 = vld [vmem:[#allocation8 + $0xe0] ss:$8 sps:$4 sm:$0xff]  }
  0x8b   :  { %v2177_v41 = vld [vmem:[#allocation8 + $0x1e0] ss:$8 sps:$4 sm:$0xff]  }
  0x8d   :  { %592 = vmatpush2.bf16.msra.mxu0 %v2085_v42  ;;  %635 = vmatpush2.bf16.msra.mxu1 %v2086_v43  ;;  %v2182_v42 = vld [vmem:[#allocation8 + $0xd4] ss:$8 sps:$4 sm:$0xff]  }
  0x8e   :  { %593 = vmatprep.subr.bf16.mxu0 %v2087_v44  ;;  %636 = vmatprep.subr.bf16.mxu1 %v2089_v45  ;;  %v2185_v43 = vld [vmem:[#allocation8 + $0x1d4] ss:$8 sps:$4 sm:$0xff]   ;;  %v2180_v44 = vld [vmem:[#allocation8 + $0xd0] ss:$8 sps:$4 sm:$0xff]  }
  0x8f   :  { %v2183_v45 = vld [vmem:[#allocation8 + $0x1d0] ss:$8 sps:$4 sm:$0xff]  }
  0x91   :  { %594 = vmatpush2.bf16.msra.mxu0 %v2091_v46  ;;  %637 = vmatpush2.bf16.msra.mxu1 %v2092_v47  ;;  %v2188_v46 = vld [vmem:[#allocation8 + $0xc4] ss:$8 sps:$4 sm:$0xff]  }
  0x92   :  { %595 = vmatprep.subr.bf16.mxu0 %v2093_v49  ;;  %638 = vmatprep.subr.bf16.mxu1 %v2095_v50  ;;  %v2191_v47 = vld [vmem:[#allocation8 + $0x1c4] ss:$8 sps:$4 sm:$0xff]   ;;  %v2189_v49 = vld [vmem:[#allocation8 + $0x1c0] ss:$8 sps:$4 sm:$0xff]   ;;  %v2194_v50 = vld [vmem:[#allocation8 + $0xb4] ss:$8 sps:$4 sm:$0xff]  }
  0x95   :  { %596 = vmatpush2.bf16.msra.mxu0 %v2097_v51  ;;  %639 = vmatpush2.bf16.msra.mxu1 %v2098_v52  ;;  %v2197_v51 = vld [vmem:[#allocation8 + $0x1b4] ss:$8 sps:$4 sm:$0xff]   ;;  %v2192_v52 = vld [vmem:[#allocation8 + $0xb0] ss:$8 sps:$4 sm:$0xff]  }
  0x96   :  { %597 = vmatprep.subr.bf16.mxu0 %v2099_v53  ;;  %640 = vmatprep.subr.bf16.mxu1 %v2101_v54  ;;  %v2195_v53 = vld [vmem:[#allocation8 + $0x1b0] ss:$8 sps:$4 sm:$0xff]   ;;  %v2200_v54 = vld [vmem:[#allocation8 + $0xa4] ss:$8 sps:$4 sm:$0xff]  }
  0x99   :  { %598 = vmatpush2.bf16.msra.mxu0 %v2103_v55  ;;  %641 = vmatpush2.bf16.msra.mxu1 %v2104_v56  ;;  %v2203_v55 = vld [vmem:[#allocation8 + $0x1a4] ss:$8 sps:$4 sm:$0xff]   ;;  %v2198_v56 = vld [vmem:[#allocation8 + $0xa0] ss:$8 sps:$4 sm:$0xff]  }
  0x9a   :  { %599 = vmatprep.subr.bf16.mxu0 %v2105_v57  ;;  %642 = vmatprep.subr.bf16.mxu1 %v2107_v58  ;;  %v2201_v57 = vld [vmem:[#allocation8 + $0x1a0] ss:$8 sps:$4 sm:$0xff]   ;;  %v2206_v58 = vld [vmem:[#allocation8 + $0x94] ss:$8 sps:$4 sm:$0xff]  }
  0x9d   :  { %600 = vmatpush2.bf16.msra.mxu0 %v2109_v59  ;;  %643 = vmatpush2.bf16.msra.mxu1 %v2110_v60  ;;  %v2209_v59 = vld [vmem:[#allocation8 + $0x194] ss:$8 sps:$4 sm:$0xff]   ;;  %v2204_v60 = vld [vmem:[#allocation8 + $0x90] ss:$8 sps:$4 sm:$0xff]  }
  0x9e   :  { %601 = vmatprep.subr.bf16.mxu0 %v2111_v61  ;;  %644 = vmatprep.subr.bf16.mxu1 %v2113_v62  ;;  %v2207_v61 = vld [vmem:[#allocation8 + $0x190] ss:$8 sps:$4 sm:$0xff]   ;;  %v2212_v62 = vld [vmem:[#allocation8 + $0x84] ss:$8 sps:$4 sm:$0xff]  }
  0xa1   :  { %602 = vmatpush2.bf16.msra.mxu0 %v2115_v63  ;;  %645 = vmatpush2.bf16.msra.mxu1 %v2116_v0  ;;  %v2215_v63 = vld [vmem:[#allocation8 + $0x184] ss:$8 sps:$4 sm:$0xff]   ;;  %v2210_v0 = vld [vmem:[#allocation8 + $0x80] ss:$8 sps:$4 sm:$0xff]  }
  0xa2   :  { %1065 = vmatprep.subr.bf16.mxu0 %v2122_v1  ;;  %1108 = vmatprep.subr.bf16.mxu1 %v2125_v2  ;;  %v2213_v1 = vld [vmem:[#allocation8 + $0x180] ss:$8 sps:$4 sm:$0xff]   ;;  %v2216_v2 = vld [vmem:[#allocation10 + $0x78] sm:$0xff]  }
  0xa4   :  { %604 = vmatmul.mubr.bf16.vlgmr.msra.gmra.mxu0 %v2117_v3  ;;  %647 = vmatmul.mubr.bf16.vlgmr.msra.gmra.mxu1 %v2117_v3  ;;  %v221_v3 = vlaneseq }
  0xa5   :  { %1066 = vmatpush1.bf16.msra.mxu0 %v2120_v4  ;;  %1109 = vmatpush1.bf16.msra.mxu1 %v2123_v5 }
  0xa6   :  { %1067 = vmatprep.subr.bf16.mxu0 %v2128_v6  ;;  %1110 = vmatprep.subr.bf16.mxu1 %v2131_v7  ;;  %v2585_v4 = vshrl.u32 %v221_v3, 7 }
  0xa8   :  { %v227_v5 = vsub.s32 1, %v2585_v4  ;;  %v235_v6 = vsub.s32 3, %v2585_v4  ;;  %v223_v7 = vsub.s32 0, %v2585_v4 }
  0xa9   :  { %1068 = vmatpush1.bf16.msra.mxu0 %v2126_v8  ;;  %1111 = vmatpush1.bf16.msra.mxu1 %v2129_v9  ;;  %v231_v8 = vsub.s32 2, %v2585_v4  ;;  %v219_v9 = vld [vmem:[#allocation7] sm:$0xf] }
  0xaa   :  { %1069 = vmatprep.subr.bf16.mxu0 %v2134_v10  ;;  %1112 = vmatprep.subr.bf16.mxu1 %v2137_v11 }
  0xad   :  { %1070 = vmatpush1.bf16.msra.mxu0 %v2132_v12  ;;  %1113 = vmatpush1.bf16.msra.mxu1 %v2135_v13  ;;  %v228_v12 = vrot.slane %v219_v9, %v227_v5  ;;  %v236_v13 = vrot.slane %v219_v9, %v235_v6 }
  0xae   :  { %1071 = vmatprep.subr.bf16.mxu0 %v2140_v14  ;;  %1114 = vmatprep.subr.bf16.mxu1 %v2143_v15  ;;  %v224_v14 = vrot.slane %v219_v9, %v223_v7  ;;  %v232_v15 = vrot.slane %v219_v9, %v231_v8 }
  0xb1   :  { %1072 = vmatpush1.bf16.msra.mxu0 %v2138_v16  ;;  %1115 = vmatpush1.bf16.msra.mxu1 %v2141_v17 }
  0xb2   :  { %1073 = vmatprep.subr.bf16.mxu0 %v2146_v18  ;;  %1116 = vmatprep.subr.bf16.mxu1 %v2149_v19 }
  0xb5   :  { %1074 = vmatpush1.bf16.msra.mxu0 %v2144_v20  ;;  %1117 = vmatpush1.bf16.msra.mxu1 %v2147_v21 }
  0xb6   :  { %1075 = vmatprep.subr.bf16.mxu0 %v2152_v22  ;;  %1118 = vmatprep.subr.bf16.mxu1 %v2155_v23 }
  0xb9   :  { %1076 = vmatpush1.bf16.msra.mxu0 %v2150_v24  ;;  %1119 = vmatpush1.bf16.msra.mxu1 %v2153_v25 }
  0xba   :  { %1077 = vmatprep.subr.bf16.mxu0 %v2158_v26  ;;  %1120 = vmatprep.subr.bf16.mxu1 %v2161_v27 }
  0xbd   :  { %1078 = vmatpush1.bf16.msra.mxu0 %v2156_v28  ;;  %1121 = vmatpush1.bf16.msra.mxu1 %v2159_v29 }
  0xbe   :  { %1079 = vmatprep.subr.bf16.mxu0 %v2164_v30  ;;  %1122 = vmatprep.subr.bf16.mxu1 %v2167_v31 }
  0xc1   :  { %1080 = vmatpush1.bf16.msra.mxu0 %v2162_v32  ;;  %1123 = vmatpush1.bf16.msra.mxu1 %v2165_v33 }
  0xc2   :  { %1081 = vmatprep.subr.bf16.mxu0 %v2170_v34  ;;  %1124 = vmatprep.subr.bf16.mxu1 %v2173_v35 }
  0xc5   :  { %1082 = vmatpush2.bf16.msra.mxu0 %v2168_v36  ;;  %1125 = vmatpush2.bf16.msra.mxu1 %v2171_v37 }
  0xc6   :  { %1083 = vmatprep.subr.bf16.mxu0 %v2176_v38  ;;  %1126 = vmatprep.subr.bf16.mxu1 %v2179_v39 }
  0xc9   :  { %1084 = vmatpush2.bf16.msra.mxu0 %v2174_v40  ;;  %1127 = vmatpush2.bf16.msra.mxu1 %v2177_v41  ;;  %v2217_v40 = vld [vmem:[#allocation10 + $0x38] sm:$0xff]  }
  0xca   :  { %1085 = vmatprep.subr.bf16.mxu0 %v2182_v42  ;;  %1128 = vmatprep.subr.bf16.mxu1 %v2185_v43  ;;  %v2218_v43 = vld [vmem:[#allocation10 + $0x70] sm:$0xff]  }
  0xcd   :  { %1086 = vmatpush2.bf16.msra.mxu0 %v2180_v44  ;;  %1129 = vmatpush2.bf16.msra.mxu1 %v2183_v45  ;;  %v2219_v44 = vld [vmem:[#allocation10 + $0x30] sm:$0xff]   ;;  %v2220_v45 = vld [vmem:[#allocation10 + $0x68] sm:$0xff]  }
  0xce   :  { %1087 = vmatprep.subr.bf16.mxu0 %v2188_v46  ;;  %1130 = vmatprep.subr.bf16.mxu1 %v2191_v47  ;;  %v2221_v46 = vld [vmem:[#allocation10 + $0x28] sm:$0xff]   ;;  %v2222_v47 = vld [vmem:[#allocation10 + $0x60] sm:$0xff]  }
  0xd1   :  { %1088 = vmatpush2.bf16.msra.mxu0 %v2186_v48  ;;  %1131 = vmatpush2.bf16.msra.mxu1 %v2189_v49  ;;  %v2223_v48 = vld [vmem:[#allocation10 + $0x20] sm:$0xff]   ;;  %v2224_v49 = vld [vmem:[#allocation10 + $0x58] sm:$0xff]  }
  0xd2   :  { %1089 = vmatprep.subr.bf16.mxu0 %v2194_v50  ;;  %1132 = vmatprep.subr.bf16.mxu1 %v2197_v51  ;;  %v2225_v50 = vld [vmem:[#allocation10 + $0x18] sm:$0xff]   ;;  %v2226_v51 = vld [vmem:[#allocation10 + $0x50] sm:$0xff]  }
  0xd5   :  { %1090 = vmatpush2.bf16.msra.mxu0 %v2192_v52  ;;  %1133 = vmatpush2.bf16.msra.mxu1 %v2195_v53  ;;  %v2227_v52 = vld [vmem:[#allocation10 + $0x10] sm:$0xff]   ;;  %v2228_v53 = vld [vmem:[#allocation10 + $0x48] sm:$0xff]  }
  0xd6   :  { %1091 = vmatprep.subr.bf16.mxu0 %v2200_v54  ;;  %1134 = vmatprep.subr.bf16.mxu1 %v2203_v55  ;;  %v2229_v54 = vld [vmem:[#allocation10 + $0x8] sm:$0xff]   ;;  %v2230_v55 = vld [vmem:[#allocation10 + $0x40] sm:$0xff]  }
  0xd9   :  { %1092 = vmatpush2.bf16.msra.mxu0 %v2198_v56  ;;  %1135 = vmatpush2.bf16.msra.mxu1 %v2201_v57  ;;  %v2231_v56 = vld [vmem:[#allocation10] sm:$0xff]   ;;  %v2232_v57 = vld [vmem:[#allocation11 + $0x38] sm:$0xff]  }
  0xda   :  { %1093 = vmatprep.subr.bf16.mxu0 %v2206_v58  ;;  %1136 = vmatprep.subr.bf16.mxu1 %v2209_v59  ;;  %v2470_v58 = vmov 0.0   ;;  %v2233_v59 = vld [vmem:[#allocation11 + $0x30] sm:$0xff]  }
  0xdd   :  { %1094 = vmatpush2.bf16.msra.mxu0 %v2204_v60  ;;  %1137 = vmatpush2.bf16.msra.mxu1 %v2207_v61  ;;  %v2234_v60 = vld [vmem:[#allocation11 + $0x28] sm:$0xff]   ;;  %v2235_v61 = vld [vmem:[#allocation11 + $0x20] sm:$0xff]  }
  0xde   :  { %1095 = vmatprep.subr.bf16.mxu0 %v2212_v62  ;;  %1138 = vmatprep.subr.bf16.mxu1 %v2215_v63  ;;  %v733_v62 = vld [vmem:[%s2654_s4] sm:$0x3] }
  0xdf   :  { %v742_v63 = vrot.slane %v733_v62, %v227_v5 }
  0xe1   :  { %1096 = vmatpush2.bf16.msra.mxu0 %v2210_v0  ;;  %1139 = vmatpush2.bf16.msra.mxu1 %v2213_v1  ;;  %v738_v0 = vrot.slane %v733_v62, %v223_v7 }
  0xe2   :  { %1895 = vmatprep.subr.bf16.mxu0 %v2216_v2  ;;  %1944 = vmatprep.subr.bf16.mxu1 %v2470_v58 }
 0x164   :  { %v605_v10 = vpop.f32.mrf.mxu0  ;;  %v648_v11 = vpop.f32.mrf.mxu1 }
 0x165   :  { %v606_v24 = vadd.f32 %v605_v10, %v224_v14  ;;  %v649_v25 = vadd.f32 %v648_v11, %v232_v15 }
 0x166   :  { %v607_v16 = vpop.f32.mrf.mxu0  ;;  %v650_v17 = vpop.f32.mrf.mxu1 }
 0x167   :  { %v608_v20 = vadd.f32 %v607_v16, %v228_v12  ;;  %v651_v21 = vadd.f32 %v650_v17, %v236_v13  ;;  %v657_v36 = vmax.f32 %v606_v24, 0.0  ;;  %v659_v37 = vmax.f32 %v649_v25, 0.0  ;;  %v2237_v24 = vld [vmem:[#allocation11 + $0x10] sm:$0xff]   ;;  %v2238_v25 = vld [vmem:[#allocation11 + $0x8] sm:$0xff]  }
 0x168   :  { %v609_v18 = vpop.f32.mrf.mxu0  ;;  %v652_v19 = vpop.f32.mrf.mxu1 }
 0x169   :  { %v610_v22 = vadd.f32 %v609_v18, %v224_v14  ;;  %v653_v23 = vadd.f32 %v652_v19, %v232_v15  ;;  %v658_v32 = vmax.f32 %v608_v20, 0.0  ;;  %v660_v33 = vmax.f32 %v651_v21, 0.0 }
 0x16a   :  { %v611_v26 = vpop.f32.mrf.mxu0  ;;  %v654_v27 = vpop.f32.mrf.mxu1 }
 0x16b   :  { %v612_v28 = vadd.f32 %v611_v26, %v228_v12  ;;  %v655_v29 = vadd.f32 %v654_v27, %v236_v13  ;;  %v661_v30 = vmax.f32 %v610_v22, 0.0  ;;  %v663_v31 = vmax.f32 %v653_v23, 0.0  ;;  %v2236_v23 = vld [vmem:[#allocation11 + $0x18] sm:$0xff]   ;;  %v2239_v26 = vld [vmem:[#allocation11] sm:$0xff]  }
 0x16c   :  { %v2240_v27 = vld [vmem:[#allocation13 + $0x38] sm:$0xff]  }
 0x16d   :  { %v662_v34 = vmax.f32 %v612_v28, 0.0  ;;  %v664_v35 = vmax.f32 %v655_v29, 0.0  ;;  %v665_v41 = vpack.c.bf16 %v661_v30, %v657_v36  ;;  %v667_v42 = vpack.c.bf16 %v663_v31, %v659_v37  ;;  %v2241_v28 = vld [vmem:[#allocation13 + $0x30] sm:$0xff]   ;;  %v2242_v29 = vld [vmem:[#allocation13 + $0x28] sm:$0xff]   ;;  %v2243_v30 = vld [vmem:[#allocation13 + $0x20] sm:$0xff]  }
 0x16e   :  { %v2244_v31 = vld [vmem:[#allocation13 + $0x18] sm:$0xff]  }
 0x16f   :  { %v666_v38 = vpack.c.bf16 %v662_v34, %v658_v32  ;;  %v668_v39 = vpack.c.bf16 %v664_v35, %v660_v33  ;;  %v1851_v35 = vld [vmem:[%s2656_s6] ss:$0 sm:$0xff] }
 0x171   :  { %1097 = vmatprep.mubr.bf16.mxu0 %v666_v38  ;;  %1140 = vmatprep.mubr.bf16.mxu1 %v668_v39 }
 0x172   :  { %1098 = vmatmul.mubr.bf16.vlgmr.msra.gmra.mxu0 %v665_v41  ;;  %1141 = vmatmul.mubr.bf16.vlgmr.msra.gmra.mxu1 %v667_v42 }
 0x173   :  { %1896 = vmatpush3.bf16.msra.mxu0 %v2217_v40  ;;  %1945 = vmatpush3.bf16.msra.mxu1 %v2232_v57 }
 0x174   :  { %1897 = vmatprep.subr.bf16.mxu0 %v2218_v43  ;;  %1946 = vmatprep.subr.bf16.mxu1 %v2470_v58 }
 0x175   :  { %1960 = vmatprep.mubr.msk.bf16.mxu1 %vm2471_vm0, %v2470_v58 }
 0x177   :  { %1898 = vmatpush3.bf16.msra.mxu0 %v2219_v44  ;;  %1947 = vmatpush3.bf16.msra.mxu1 %v2233_v59  ;;  %v2245_v44 = vld [vmem:[#allocation13 + $0x10] sm:$0xff]  }
 0x178   :  { %1899 = vmatprep.subr.bf16.mxu0 %v2220_v45  ;;  %1948 = vmatprep.subr.bf16.mxu1 %v2470_v58  ;;  %v2246_v45 = vld [vmem:[#allocation13 + $0x8] sm:$0xff]  }
 0x17b   :  { %1900 = vmatpush3.bf16.msra.mxu0 %v2221_v46  ;;  %1949 = vmatpush3.bf16.msra.mxu1 %v2234_v60  ;;  %v2247_v46 = vld [vmem:[#allocation13] sm:$0xff]  }
 0x17c   :  { %1901 = vmatprep.subr.bf16.mxu0 %v2222_v47  ;;  %1950 = vmatprep.subr.bf16.mxu1 %v2470_v58  ;;  %v2248_v47 = vld [vmem:[#allocation14 + $0x38] sm:$0xff]  }
 0x17f   :  { %1902 = vmatpush3.bf16.msra.mxu0 %v2223_v48  ;;  %1951 = vmatpush3.bf16.msra.mxu1 %v2235_v61  ;;  %v2249_v48 = vld [vmem:[#allocation14 + $0x30] sm:$0xff]  }
 0x180   :  { %1903 = vmatprep.subr.bf16.mxu0 %v2224_v49  ;;  %1952 = vmatprep.subr.bf16.mxu1 %v2470_v58  ;;  %v2250_v49 = vld [vmem:[#allocation14 + $0x28] sm:$0xff]  }
 0x183   :  { %1904 = vmatpush3.bf16.msra.mxu0 %v2225_v50  ;;  %1953 = vmatpush3.bf16.msra.mxu1 %v2236_v23  ;;  %v2251_v50 = vld [vmem:[#allocation14 + $0x20] sm:$0xff]  }
 0x184   :  { %1905 = vmatprep.subr.bf16.mxu0 %v2226_v51  ;;  %1954 = vmatprep.subr.bf16.mxu1 %v2470_v58  ;;  %v2252_v51 = vld [vmem:[#allocation14 + $0x18] sm:$0xff]  }
 0x187   :  { %1906 = vmatpush3.bf16.msra.mxu0 %v2227_v52  ;;  %1955 = vmatpush3.bf16.msra.mxu1 %v2237_v24  ;;  %v1868_v52 = vld [vmem:[%s2658_s8] ss:$0 sm:$0xff] }
 0x188   :  { %1907 = vmatprep.subr.bf16.mxu0 %v2228_v53  ;;  %1956 = vmatprep.subr.bf16.mxu1 %v2470_v58 }
 0x18b   :  { %1908 = vmatpush3.bf16.msra.mxu0 %v2229_v54  ;;  %1957 = vmatpush3.bf16.msra.mxu1 %v2238_v25 }
 0x18c   :  { %1909 = vmatprep.subr.bf16.mxu0 %v2230_v55  ;;  %1958 = vmatprep.subr.bf16.mxu1 %v2470_v58 }
 0x18f   :  { %1910 = vmatpush3.bf16.msra.mxu0 %v2231_v56  ;;  %1959 = vmatpush3.bf16.msra.mxu1 %v2239_v26 }
 0x190   :  { %1964 = vmatprep.subr.bf16.mxu0 %v2470_v58  ;;  %1984 = vmatprep.subr.bf16.mxu1 %v2470_v58 }
 0x232   :  { %v1099_v1 = vpop.f32.mrf.mxu0  ;;  %v1142_v2 = vpop.f32.mrf.mxu1 }
 0x233   :  { %v1100_v9 = vadd.f32 %v1099_v1, %v738_v0  ;;  %v2255_v1 = vld [vmem:[#allocation14] sm:$0xff]  }
 0x234   :  { %v1101_v3 = vpop.f32.mrf.mxu0  ;;  %v1144_v6 = vpop.f32.mrf.mxu1 }
 0x235   :  { %v1102_v8 = vadd.f32 %v1101_v3, %v742_v63  ;;  %v1143_v17 = vadd.f32 %v1142_v2, %v1100_v9  ;;  %v1877_v2 = vld [vmem:[%s2660_s10] ss:$0 sm:$0xff]  ;;  %s2472_s10 = smov [#allocation16]  }
 0x236   :  { %v1103_v10 = vpop.f32.mrf.mxu0  ;;  %v1146_v11 = vpop.f32.mrf.mxu1 }
 0x237   :  { %v1104_v12 = vadd.f32 %v1103_v10, %v738_v0  ;;  %v1145_v14 = vadd.f32 %v1144_v6, %v1102_v8  ;;  %v1151_v7 = vmax.f32 %v1143_v17, 0.0  ;;  %v2254_v0 = vld [vmem:[#allocation14 + $0x8] sm:$0xff]  }
 0x238   :  { %v1105_v13 = vpop.f32.mrf.mxu0  ;;  %v1148_v18 = vpop.f32.mrf.mxu1 }
 0x239   :  { %v1147_v15 = vadd.f32 %v1146_v11, %v1104_v12  ;;  %v1106_v16 = vadd.f32 %v1105_v13, %v742_v63  ;;  %v1152_v20 = vmax.f32 %v1145_v14, 0.0  ;;  %v2253_v63 = vld [vmem:[#allocation14 + $0x10] sm:$0xff]  }
 0x23b   :  { %v1149_v19 = vadd.f32 %v1148_v18, %v1106_v16  ;;  %v1153_v5 = vmax.f32 %v1147_v15, 0.0 }
 0x23d   :  { %v1154_v4 = vmax.f32 %v1149_v19, 0.0  ;;  %v1155_v22 = vpack.c.bf16 %v1153_v5, %v1151_v7 }
 0x23f   :  { %v1156_v21 = vpack.c.bf16 %v1154_v4, %v1152_v20 }
 0x241   :  { %1324 = vmatprep.mubr.bf16.mxu0 %v1156_v21 }
 0x242   :  { %1325 = vmatmul.mubr.bf16.vlgmr.msra.gmra.mxu0 %v1155_v22 }
 0x243   :  { %1980 = vmatprep.mubr.msk.bf16.mxu0 %vm2471_vm0, %v2470_v58  ;;  %1965 = vmatpush3.bf16.msra.mxu0 %v2240_v27 }
 0x244   :  { %1966 = vmatprep.subr.bf16.mxu0 %v2470_v58 }
 0x247   :  { %1967 = vmatpush3.bf16.msra.mxu0 %v2241_v28 }
 0x248   :  { %1968 = vmatprep.subr.bf16.mxu0 %v2470_v58 }
 0x24b   :  { %1969 = vmatpush3.bf16.msra.mxu0 %v2242_v29 }
 0x24c   :  { %1970 = vmatprep.subr.bf16.mxu0 %v2470_v58 }
 0x24f   :  { %1971 = vmatpush3.bf16.msra.mxu0 %v2243_v30 }
 0x250   :  { %1972 = vmatprep.subr.bf16.mxu0 %v2470_v58 }
 0x253   :  { %1973 = vmatpush3.bf16.msra.mxu0 %v2244_v31 }
 0x254   :  { %1974 = vmatprep.subr.bf16.mxu0 %v2470_v58 }
 0x257   :  { %1975 = vmatpush3.bf16.msra.mxu0 %v2245_v44 }
 0x258   :  { %1976 = vmatprep.subr.bf16.mxu0 %v2470_v58 }
 0x25b   :  { %1977 = vmatpush3.bf16.msra.mxu0 %v2246_v45 }
 0x25c   :  { %1978 = vmatprep.subr.bf16.mxu0 %v2470_v58 }
 0x25f   :  { %1979 = vmatpush3.bf16.msra.mxu0 %v2247_v46 }
 0x302   :  { %v1911_v32 = vpop.f32.mrf.mxu0 }
 0x304   :  { %v1912_v33 = vpop.f32.mrf.mxu0 }
 0x305   :  { %v1913_v34 = vadd.f32 %v1912_v33, %v1911_v32 }
 0x306   :  { %v1914_v36 = vpop.f32.mrf.mxu0 }
 0x307   :  { %v1327_v38 = vadd.f32 %v1913_v34, %v1851_v35 }
 0x308   :  { %v1915_v37 = vpop.f32.mrf.mxu0 }
 0x309   :  { %v1916_v39 = vadd.f32 %v1915_v37, %v1914_v36  ;;  %v1333_v41 = vmax.f32 %v1327_v38, 0.0 }
 0x30b   :  { %v1330_v40 = vadd.f32 %v1916_v39, %v1851_v35 }
 0x30d   :  { %v1334_v42 = vmax.f32 %v1330_v40, 0.0 }
 0x30f   :  { %v1335_v43 = vpack.c.bf16 %v1334_v42, %v1333_v41 }
 0x311   :  { %1961 = vmatmul.mubr.bf16.vlgmr.msra.gmra.mxu1 %v1335_v43 }
 0x312   :  { %2000 = vmatprep.mubr.msk.bf16.mxu1 %vm2471_vm0, %v2470_v58  ;;  %1985 = vmatpush3.bf16.msra.mxu1 %v2248_v47 }
 0x313   :  { %1986 = vmatprep.subr.bf16.mxu1 %v2470_v58 }
 0x316   :  { %1987 = vmatpush3.bf16.msra.mxu1 %v2249_v48 }
 0x317   :  { %1988 = vmatprep.subr.bf16.mxu1 %v2470_v58 }
 0x31a   :  { %1989 = vmatpush3.bf16.msra.mxu1 %v2250_v49 }
 0x31b   :  { %1990 = vmatprep.subr.bf16.mxu1 %v2470_v58 }
 0x31e   :  { %1991 = vmatpush3.bf16.msra.mxu1 %v2251_v50 }
 0x31f   :  { %1992 = vmatprep.subr.bf16.mxu1 %v2470_v58 }
 0x322   :  { %1993 = vmatpush3.bf16.msra.mxu1 %v2252_v51 }
 0x323   :  { %1994 = vmatprep.subr.bf16.mxu1 %v2470_v58 }
 0x326   :  { %1995 = vmatpush3.bf16.msra.mxu1 %v2253_v63 }
 0x327   :  { %1996 = vmatprep.subr.bf16.mxu1 %v2470_v58 }
 0x32a   :  { %1997 = vmatpush3.bf16.msra.mxu1 %v2254_v0 }
 0x32b   :  { %1998 = vmatprep.subr.bf16.mxu1 %v2470_v58  ;;  %v1886_v58 = vld [vmem:[%s2662_s12] ss:$0 sm:$0xff]  ;;  %s1705_s12 = sshll.u32 %s2472_s10, 4  ;;  %s1706_s12 = int_to_ptr.vmem [resolvable:$true] %s1705_s12 }
 0x32c   :  { %s2424_s7 = scalar_lea.vmem %s1706_s12, 256  ;;  %p2429_p13 = scmp.lt.s32.totalorder %s1706_s12, %s1706_s12 }
 0x32d   :  { %p2425_p12 = scmp.ne.s32.totalorder %s1706_s12, %s2424_s7  ;;  %p2430_p0 = scmp.lt.s32.totalorder %s2424_s7, %s2424_s7 }
 0x32e   :  { %1999 = vmatpush3.bf16.msra.mxu1 %v2255_v1 }
 0x32f   :  { %p2431_p1 = por %p2430_p0, %p2429_p13 }
 0x331   :  { %p2432_p2 = pnand %p2431_p1, %p2425_p12 }
 0x3d1   :  { %v1441_v53 = vpop.f32.mrf.mxu1 }
 0x3d2   :  { %v1442_v55 = vadd.f32 %v1868_v52, %v1441_v53 }
 0x3d3   :  { %v1962_v54 = vpop.f32.mrf.mxu1 }
 0x3d4   :  { %v1448_v60 = vmax.f32 %v1442_v55, 0.0 }
 0x3d5   :  { %v1444_v56 = vpop.f32.mrf.mxu1 }
 0x3d6   :  { %v1445_v57 = vadd.f32 %v1868_v52, %v1444_v56 }
 0x3d7   :  { %v1963_v59 = vpop.f32.mrf.mxu1 }
 0x3d8   :  { %v1449_v61 = vmax.f32 %v1445_v57, 0.0 }
 0x3da   :  { %v1450_v62 = vpack.c.bf16 %v1449_v61, %v1448_v60 }
 0x3dc   :  { %1981 = vmatmul.mubr.bf16.vlgmr.msra.gmra.mxu0 %v1450_v62 }
 0x49c   :  { %v1556_v3 = vpop.f32.mrf.mxu0 }
 0x49d   :  { %v1557_v8 = vadd.f32 %v1877_v2, %v1556_v3 }
 0x49e   :  { %v1982_v6 = vpop.f32.mrf.mxu0 }
 0x49f   :  { %v1563_v12 = vmax.f32 %v1557_v8, 0.0 }
 0x4a0   :  { %v1559_v9 = vpop.f32.mrf.mxu0 }
 0x4a1   :  { %v1560_v10 = vadd.f32 %v1877_v2, %v1559_v9 }
 0x4a2   :  { %v1983_v11 = vpop.f32.mrf.mxu0 }
 0x4a3   :  { %v1564_v13 = vmax.f32 %v1560_v10, 0.0 }
 0x4a5   :  { %v1565_v14 = vpack.c.bf16 %v1564_v13, %v1563_v12 }
 0x4a7   :  { %2001 = vmatmul.mubr.bf16.vlgmr.msra.gmra.mxu1 %v1565_v14 }
 0x567   :  { %v1671_v15 = vpop.f32.mrf.mxu1 }
 0x568   :  { %v1672_v16 = vadd.f32 %v1886_v58, %v1671_v15 }
 0x569   :  { %v2002_v17 = vpop.f32.mrf.mxu1 }
 0x56a   :  { %1678 = vmax.xlane.f32.xlu0 %v1672_v16 }
 0x56b   :  { %v1674_v18 = vpop.f32.mrf.mxu1 }
 0x56c   :  { %v1675_v19 = vadd.f32 %v1886_v58, %v1674_v18 }
 0x56d   :  { %v2003_v5 = vpop.f32.mrf.mxu1 }
 0x56e   :  { %1680 = vmax.xlane.f32.xlu0 %v1675_v19 }
 0x5f3   :  { %v1679_v20 = vpop.xlane.xlu0 %1678 }
 0x5f4   :  { %v1682_v4 = vsub.f32 %v1672_v16, %v1679_v20 }
 0x5f6   :  { %v1684_v7 = vmul.f32 1.442695, %v1682_v4 }
 0x5f7   :  { %v1681_v21 = vpop.xlane.xlu0 %1680 }
 0x5f8   :  { %v1683_v22 = vsub.f32 %v1675_v19, %v1681_v21  ;;  %2256 = vpow2.f32 %v1684_v7 }
 0x5fa   :  { %v1686_v23 = vmul.f32 1.442695, %v1683_v22 }
 0x5fc   :  { %2258 = vpow2.f32 %v1686_v23 }
 0x605   :  { %v2257_v24 = vpop.eup %2256 }
 0x606   :  { %1688 = vadd.xlane.f32.xlu1 %v2257_v24 }
 0x609   :  { %v2259_v25 = vpop.eup %2258 }
 0x60a   :  { %1690 = vadd.xlane.f32.xlu1 %v2259_v25 }
 0x68f   :  { %v1689_v26 = vpop.xlane.xlu1 %1688 }
 0x690   :  { %2260 = vlog2.f32 %v1689_v26 }
 0x693   :  { %v1691_v27 = vpop.xlane.xlu1 %1690 }
 0x694   :  { %2262 = vlog2.f32 %v1691_v27 }
 0x69d   :  { %v2261_v28 = vpop.eup %2260 }
 0x69e   :  { %v1693_v29 = vmul.f32 0.6931472, %v2261_v28 }
 0x6a0   :  { %v1696_v30 = vsub.f32 %v1682_v4, %v1693_v29 }
 0x6a1   :  { %v2263_v31 = vpop.eup %2262 }
 0x6a2   :  { %v1695_v32 = vmul.f32 0.6931472, %v2263_v31  ;;  %1698 = vst [vmem:[#allocation16] sm:$0xff] %v1696_v30 }
 0x6a4   :  { %v1697_v33 = vsub.f32 %v1683_v22, %v1695_v32 }
 0x6a6   :  { %1699 = vst [vmem:[#allocation16 + $0x8] sm:$0xff] %v1697_v33 }
 0x6a7   :  { %2435 = shalt.err (!%p2432_p2)
}
 0x6a8   :  { %1711 = dma.vmem_to_hbm [thread:$0]  %s1706_s12, 256, %s2663_s13, [#allocation4], %s2460_s18, %s2460_s18, %s2461_s19  }
 0x6a9   :  { %2454 = dma.done.wait [#allocation4], 256  }
 0x6aa   :  { %2455 = vsyncadd [#allocation4], 4294967040 }
 0x6ab   :  { %1715 = vsyncpa [#allocation3], 1 }
 0x6ac   :  { %1716 = vsyncpa [#allocation6], 1 }
 0x6ad   :  { %1717 = vsyncpa [#allocation9], 1 }
 0x6ae   :  { %1718 = vsyncpa [#allocation12], 1 }
 0x6af   :  { %1719 = vsyncpa [#allocation15], 1 }
 0x6b0   :  { %1720 = vsyncpa [#allocation4], 1 }

</bundles_post_ra>
